<compile_context>
chip_gen: v6e
topology: v6e:2x2x1
jax: 0.10.0
libtpu: 0.0.40
codegen_flags: <defaults>
</compile_context>

<pallas_src>
import functools

import jax
import jax.numpy as jnp
from jax import lax
from jax.experimental import pallas as pl
from jax.experimental.pallas import tpu as pltpu

EPS = 1e-5  # torch.nn.BatchNorm1d default


# ----------------------------------------------------------------------------
# helpers
# ----------------------------------------------------------------------------
def _cdiv(a, b):
    return (a + b - 1) // b


def _round_up(a, m):
    return ((a + m - 1) // m) * m


def _vmem_capacity_bytes():
    try:
        return int(pltpu.get_tpu_info().vmem_capacity_bytes)
    except Exception:
        return 64 << 20  # conservative (v7x per-TC VMEM)


def _row_tiles(B8, target_rows, max_rows):
    """Pick a row tile (multiple of 8) and balance it over the tile count."""
    tb = int(min(max(int(target_rows), 8), max(int(max_rows), 8), B8))
    tb = max(8, (tb // 8) * 8)
    nb = _cdiv(B8, tb)
    tb = _round_up(_cdiv(B8, nb), 8)
    return tb, nb, nb * tb


def _lens_tile(lens_ref, i, tb, lens_whole):
    if lens_whole:
        row0 = pl.multiple_of(i * tb, 8)
        return lens_ref[pl.ds(row0, tb), :]          # (tb, 1) slice of (B,1)
    return lens_ref[...]                              # per-tile (tb, 1) block


# ----------------------------------------------------------------------------
# Kernel 1: fused resident path  --  grid = (2, nb)
#   phase 0: stream x tiles in, accumulate (cnt, mean, M2) via Chan merge,
#            park each tile in a resident VMEM scratch
#   phase 1: normalize from the resident scratch, stream output tiles out
# ----------------------------------------------------------------------------
def _rbn_fused_kernel(x_ref, lens_ref, gb_ref, out_ref,
                      cnt_sc, mean_sc, m2_sc, xres_ref, *, tb):
    p = pl.program_id(0)
    i = pl.program_id(1)
    row0 = pl.multiple_of(i * tb, 8)

    @pl.when(jnp.logical_and(p == 0, i == 0))
    def _init():
        cnt_sc[...] = jnp.zeros_like(cnt_sc)
        mean_sc[...] = jnp.zeros_like(mean_sc)
        m2_sc[...] = jnp.zeros_like(m2_sc)

    lens_t = lens_ref[pl.ds(row0, tb), :]             # (tb, 1) int32

    @pl.when(p == 0)
    def _stats():
        x_raw = x_ref[...]
        x = x_raw.astype(jnp.float32)                 # (tb, Tp)
        col = lax.broadcasted_iota(jnp.int32, x.shape, 1)
        mask = col < lens_t

        cnt_i = jnp.sum(lens_t.astype(jnp.float32))   # 0-d
        xm = jnp.where(mask, x, 0.0)
        sum_i = jnp.sum(xm)                           # 0-d
        mean_i = sum_i / jnp.maximum(cnt_i, 1.0)
        d = jnp.where(mask, x - mean_i, 0.0)
        m2_i = jnp.sum(d * d)                         # 0-d, tile-centered

        # Chan / Welford chunk merge into the running (cnt, mean, M2).
        n_a = cnt_sc[...]                             # (1,1)
        mean_a = mean_sc[...]
        n = n_a + cnt_i
        n_safe = jnp.maximum(n, 1.0)
        delta = mean_i - mean_a
        cnt_sc[...] = n
        mean_sc[...] = mean_a + delta * (cnt_i / n_safe)
        m2_sc[...] = m2_sc[...] + m2_i + delta * delta * (n_a * cnt_i / n_safe)

        # Park the raw tile so phase 1 never touches HBM for x again.
        xres_ref[pl.ds(row0, tb), :] = x_raw

    @pl.when(p == 1)
    def _apply():
        x = xres_ref[pl.ds(row0, tb), :].astype(jnp.float32)
        col = lax.broadcasted_iota(jnp.int32, x.shape, 1)
        mask = col < lens_t

        cnt = jnp.maximum(jnp.sum(cnt_sc[...]), 1.0)  # 0-d scalars
        mean = jnp.sum(mean_sc[...])
        var = jnp.maximum(jnp.sum(m2_sc[...]) / cnt, 0.0)
        inv_std = lax.rsqrt(var + EPS)
        scale = inv_std * gb_ref[0]
        shift = gb_ref[1] - mean * scale
        out_ref[...] = jnp.where(mask, x * scale + shift, x).astype(out_ref.dtype)


# ----------------------------------------------------------------------------
# Kernel 2a: gridded pass 0 -- per-tile partial stats into a lane-dense
# (nb, 8, 128) slab (rows 0/1/2 = cnt / sum / centered M2), "parallel" axis.
# ----------------------------------------------------------------------------
def _rbn_stats_kernel(x_ref, lens_ref, part_ref, *, tb, lens_whole):
    i = pl.program_id(0)
    x = x_ref[...].astype(jnp.float32)                # (tb, Tp)
    lens_t = _lens_tile(lens_ref, i, tb, lens_whole)  # (tb, 1) int32
    col = lax.broadcasted_iota(jnp.int32, x.shape, 1)
    mask = col < lens_t

    cnt_i = jnp.sum(lens_t.astype(jnp.float32))
    xm = jnp.where(mask, x, 0.0)
    sum_i = jnp.sum(xm)
    mean_i = sum_i / jnp.maximum(cnt_i, 1.0)
    d = jnp.where(mask, x - mean_i, 0.0)
    m2_i = jnp.sum(d * d)

    row = lax.broadcasted_iota(jnp.int32, (8, 128), 0)
    vals = jnp.where(row == 0, cnt_i,
                     jnp.where(row == 1, sum_i,
                               jnp.where(row == 2, m2_i, 0.0)))
    part_ref[...] = vals[None].astype(jnp.float32)    # (1, 8, 128) unmasked store


# ----------------------------------------------------------------------------
# Kernel 2b: gridded pass 1 -- apply folded scale/shift ("parallel" axis)
# ----------------------------------------------------------------------------
def _rbn_apply_kernel(x_ref, lens_ref, ss_ref, out_ref, *, tb, lens_whole):
    i = pl.program_id(0)
    x = x_ref[...].astype(jnp.float32)
    lens_t = _lens_tile(lens_ref, i, tb, lens_whole)
    col = lax.broadcasted_iota(jnp.int32, x.shape, 1)
    mask = col < lens_t
    scale = ss_ref[0]
    shift = ss_ref[1]
    out_ref[...] = jnp.where(mask, x * scale + shift, x).astype(out_ref.dtype)


# ----------------------------------------------------------------------------
# Wrapper
# ----------------------------------------------------------------------------
def rbatchnorm_with_lens(x, seq_lens, gamma, beta, *,
                         out_dtype=jnp.float32,
                         force_gridded=False,
                         row_tile=None):
    """x: (B, T) float, seq_lens: (B,) int, gamma/beta: (1,) -> (B, T, 1)."""
    x = jnp.asarray(x)
    if not jnp.issubdtype(x.dtype, jnp.floating):
        x = x.astype(jnp.float32)
    B, T = x.shape
    lens = jnp.clip(jnp.asarray(seq_lens).astype(jnp.int32), 0, T)
    gb = jnp.concatenate(
        [jnp.asarray(gamma, jnp.float32).reshape(-1),
         jnp.asarray(beta, jnp.float32).reshape(-1)]).astype(jnp.float32)

    xbytes = x.dtype.itemsize
    obytes = jnp.dtype(out_dtype).itemsize
    cap = _vmem_capacity_bytes()

    # Lane-dense layout: pad T to a multiple of 128 when T >= 128; tiny T
    # keeps full-dim lane blocks (padding would multiply HBM traffic).
    if T % 128 == 0 or T < 128:
        T_pad = T
    else:
        T_pad = _round_up(T, 128)
    B8 = _round_up(max(B, 1), 8)
    row_bytes = max(T_pad * xbytes, 1)

    # ---- tile planning ------------------------------------------------------
    if row_tile is not None:
        tb0 = min(max(8, _round_up(int(row_tile), 8)), B8)
        nb0 = _cdiv(B8, tb0)
        tb0 = _round_up(_cdiv(B8, nb0), 8)
        plan_res = plan_grd = (tb0, nb0, nb0 * tb0)
    else:
        plan_res = _row_tiles(B8, (2 << 20) // row_bytes,
                              max(cap // 8, 2 << 20) // row_bytes)
        per_row_pipe = 2 * T_pad * (xbytes + obytes)
        plan_grd = _row_tiles(B8, (4 << 20) // row_bytes,
                              (cap // 3) // max(per_row_pipe, 1))

    tb_r, nb_r, Bp_r = plan_res
    need_res = (Bp_r * T_pad * xbytes                      # resident copy of x
                + 2 * tb_r * T_pad * (xbytes + obytes)     # pipelined in/out tiles
                + Bp_r * 128 * 4                           # lens (lane padded)
                + (2 << 20))                               # compiler headroom
    use_resident = (not force_gridded) and (need_res <= int(cap * 0.85))

    tb, nb, B_pad = plan_res if use_resident else plan_grd

    # ---- pad to the lane/sublane-dense layout -------------------------------
    if B_pad != B or T_pad != T:
        xp = jnp.pad(x, ((0, B_pad - B), (0, T_pad - T)))
    else:
        xp = x
    lens2d = jnp.pad(lens, (0, B_pad - B)).reshape(B_pad, 1)

    if use_resident:
        # ---------------- fused, streamed resident path -------------------
        vmem_limit = int(min(int(cap * 0.9), max(need_res + (2 << 20), 8 << 20)))
        out = pl.pallas_call(
            functools.partial(_rbn_fused_kernel, tb=tb),
            out_shape=jax.ShapeDtypeStruct((B_pad, T_pad), out_dtype),
            grid=(2, nb),
            in_specs=[
                # phase 0: walk the row tiles; phase 1: pin to the last tile
                # (no refetch -> ~1x HBM read total).
                pl.BlockSpec((tb, T_pad),
                             lambda p, i: (i * (1 - p) + (nb - 1) * p, 0)),
                # seq_lens fetched once as a whole (B,1) block.
                pl.BlockSpec((B_pad, 1), lambda p, i: (0, 0)),
                pl.BlockSpec(memory_space=pltpu.MemorySpace.SMEM),   # [gamma, beta]
            ],
            # phase 0: parked at block 0 (never written); phase 1: one tile/step.
            out_specs=pl.BlockSpec((tb, T_pad), lambda p, i: (i * p, 0)),
            scratch_shapes=[
                pltpu.VMEM((1, 1), jnp.float32),          # running count
                pltpu.VMEM((1, 1), jnp.float32),          # running mean
                pltpu.VMEM((1, 1), jnp.float32),          # running M2
                pltpu.VMEM((B_pad, T_pad), x.dtype),      # resident copy of x
            ],
            compiler_params=pltpu.CompilerParams(
                dimension_semantics=("arbitrary", "arbitrary"),
                vmem_limit_bytes=vmem_limit),
            cost_estimate=pl.CostEstimate(
                flops=12 * B_pad * T_pad,
                transcendentals=nb,
                bytes_accessed=B_pad * T_pad * (xbytes + obytes)),
        )(xp, lens2d, gb)
        if B_pad != B or T_pad != T:
            out = out[:B, :T]
        return out.reshape(B, T, 1)

    # ---------------- gridded two-call path (large arrays) -------------------
    lens_whole = (B_pad * 128 * 4) <= max(cap // 8, 4 << 20)
    lens_bytes = B_pad * 128 * 4 if lens_whole else 2 * tb * 128 * 4
    vmem_limit = int(min(int(cap * 0.9),
                         max(2 * tb * T_pad * (xbytes + obytes)
                             + lens_bytes + (4 << 20), 8 << 20)))
    if lens_whole:
        lens_spec = pl.BlockSpec((B_pad, 1), lambda i: (0, 0))
    else:
        lens_spec = pl.BlockSpec((tb, 1), lambda i: (i, 0))

    # Pass 0: per-tile partial stats (parallel -> both v7x TensorCores).
    parts = pl.pallas_call(
        functools.partial(_rbn_stats_kernel, tb=tb, lens_whole=lens_whole),
        out_shape=jax.ShapeDtypeStruct((nb, 8, 128), jnp.float32),
        grid=(nb,),
        in_specs=[
            pl.BlockSpec((tb, T_pad), lambda i: (i, 0)),
            lens_spec,
        ],
        out_specs=pl.BlockSpec((1, 8, 128), lambda i: (i, 0, 0)),
        compiler_params=pltpu.CompilerParams(
            dimension_semantics=("parallel",),
            vmem_limit_bytes=vmem_limit),
        cost_estimate=pl.CostEstimate(
            flops=8 * B_pad * T_pad, transcendentals=0,
            bytes_accessed=B_pad * T_pad * xbytes),
    )(xp, lens2d)

    # Tiny JAX finalize: exact combination of the per-tile centered stats.
    cnt_i = parts[:, 0, 0]
    sum_i = parts[:, 1, 0]
    m2_i = parts[:, 2, 0]
    n = jnp.sum(cnt_i)
    n_safe = jnp.maximum(n, 1.0)
    mean = jnp.sum(sum_i) / n_safe
    mean_i = sum_i / jnp.maximum(cnt_i, 1.0)
    m2 = jnp.sum(m2_i) + jnp.sum(cnt_i * jnp.square(mean_i - mean))
    var = jnp.maximum(m2 / n_safe, 0.0)
    inv_std = lax.rsqrt(var + EPS)
    scale = gb[0] * inv_std
    shift = gb[1] - mean * scale
    ss = jnp.stack([scale, shift]).astype(jnp.float32)

    # Pass 1: apply folded scale/shift.
    out = pl.pallas_call(
        functools.partial(_rbn_apply_kernel, tb=tb, lens_whole=lens_whole),
        out_shape=jax.ShapeDtypeStruct((B_pad, T_pad), out_dtype),
        grid=(nb,),
        in_specs=[
            pl.BlockSpec((tb, T_pad), lambda i: (i, 0)),
            lens_spec,
            pl.BlockSpec(memory_space=pltpu.MemorySpace.SMEM),
        ],
        out_specs=pl.BlockSpec((tb, T_pad), lambda i: (i, 0)),
        compiler_params=pltpu.CompilerParams(
            dimension_semantics=("parallel",),
            vmem_limit_bytes=vmem_limit),
        cost_estimate=pl.CostEstimate(
            flops=5 * B_pad * T_pad, transcendentals=0,
            bytes_accessed=B_pad * T_pad * (xbytes + obytes)),
    )(xp, lens2d, ss)

    if B_pad != B or T_pad != T:
        out = out[:B, :T]
    return out.reshape(B, T, 1)


# ----------------------------------------------------------------------------
# Pure-JAX reference (mirrors PyTorch RBatchNormWithLens forward)
# ----------------------------------------------------------------------------
def _reference(x, seq_lens, gamma, beta):
    B, T = x.shape
    mask = jnp.arange(T)[None, :] < seq_lens[:, None]
    maskf = mask.astype(jnp.float32)
    cnt = jnp.maximum(jnp.sum(maskf), 1.0)
    mean = jnp.sum(x * maskf) / cnt
    var = jnp.sum(((x - mean) * maskf) ** 2) / cnt
    y = (x - mean) / jnp.sqrt(var + EPS) * gamma[0] + beta[0]
    return jnp.where(mask, y, x)[..., None]


if __name__ == "__main__":
    key = jax.random.PRNGKey(0)
    k1, k2, k3, k4, k5 = jax.random.split(key, 5)

    # ---- 1) small batch -> fused resident path (nb == 1) ----
    B, T = 4, 16
    x = jax.random.normal(k1, (B, T), dtype=jnp.float32)
    seq_lens = jnp.array([16, 10, 5, 1], dtype=jnp.int32)
    pad_mask = jnp.arange(T)[None, :] < seq_lens[:, None]
    x = jnp.where(pad_mask, x, 0.0)              # PaddedBatch: pads are zeros

    gamma = jnp.array([1.0], dtype=jnp.float32)  # BatchNorm1d(1) default init
    beta = jnp.array([0.0], dtype=jnp.float32)

    out = jax.block_until_ready(rbatchnorm_with_lens(x, seq_lens, gamma, beta))
    ref = _reference(x, seq_lens, gamma, beta)
    assert out.shape == (B, T, 1)
    assert jnp.allclose(out, ref, atol=1e-4, rtol=1e-4)

    # ---- 2) gridded split path (forced; row padding + parallel partials) ----
    B2, T2 = 20, 256
    x2 = jax.random.normal(k2, (B2, T2), dtype=jnp.float32) * 2.0 + 3.0
    lens2 = jax.random.randint(k3, (B2,), 1, T2 + 1).astype(jnp.int32)
    mask2 = jnp.arange(T2)[None, :] < lens2[:, None]
    x2 = jnp.where(mask2, x2, 0.0)

    gamma2 = jnp.array([1.3], dtype=jnp.float32)
    beta2 = jnp.array([-0.2], dtype=jnp.float32)

    out2 = jax.block_until_ready(
        rbatchnorm_with_lens(x2, lens2, gamma2, beta2,
                             force_gridded=True, row_tile=8))
    ref2 = _reference(x2, lens2, gamma2, beta2)
    assert out2.shape == (B2, T2, 1)
    assert jnp.allclose(out2, ref2, atol=1e-4, rtol=1e-4)

    # ---- 3) fused resident path with multiple row tiles + T/B padding ----
    B3, T3 = 40, 200
    x3 = jax.random.normal(k4, (B3, T3), dtype=jnp.float32) * 3.0 + 5.0
    lens3 = jax.random.randint(k5, (B3,), 1, T3 + 1).astype(jnp.int32)
    mask3 = jnp.arange(T3)[None, :] < lens3[:, None]
    x3 = jnp.where(mask3, x3, 0.0)

    out3 = jax.block_until_ready(
        rbatchnorm_with_lens(x3, lens3, gamma2, beta2, row_tile=16))
    ref3 = _reference(x3, lens3, gamma2, beta2)
    assert out3.shape == (B3, T3, 1)
    assert jnp.allclose(out3, ref3, atol=1e-4, rtol=1e-4)

    print("KERNEL_OK")
</pallas_src>

<mosaic_0001>
module attributes {stable_mosaic.version = 11 : i64} {
  func.func @_rbn_fused_kernel(%arg0: i32, %arg1: i32, %arg2: memref<8x16xf32, #tpu.memory_space<vmem>>, %arg3: memref<8x1xi32, #tpu.memory_space<vmem>>, %arg4: memref<2xf32, #tpu.memory_space<smem>>, %arg5: memref<8x16xf32, #tpu.memory_space<vmem>>, %arg6: memref<1x1xf32, #tpu.memory_space<vmem>>, %arg7: memref<1x1xf32, #tpu.memory_space<vmem>>, %arg8: memref<1x1xf32, #tpu.memory_space<vmem>>, %arg9: memref<8x16xf32, #tpu.memory_space<vmem>>) attributes {dimension_semantics = [#tpu.dimension_semantics<arbitrary>, #tpu.dimension_semantics<arbitrary>], iteration_bounds = array<i64: 2, 1>, scalar_prefetch = 0 : i64, scratch_operands = 4 : i64, tpu.core_type = #tpu.core_type<tc>, window_params = [{transform_indices = @transform_0, window_bounds = array<i64: 8, 16>}, {pipeline_mode = #tpu.pipeline_mode<synchronous>, transform_indices = @transform_1, window_bounds = array<i64: 8, 1>}, {transform_indices = @transform_2, window_bounds = array<i64: 2>}, {transform_indices = @transform_3, window_bounds = array<i64: 8, 16>}]} {
    %c8_i32 = arith.constant 8 : i32
    %0 = arith.muli %arg1, %c8_i32 : i32
    %1 = tpu.assume_multiple %0, 8 : i32
    %c0_i32 = arith.constant 0 : i32
    %2 = arith.cmpi eq, %arg0, %c0_i32 : i32
    %c0_i32_0 = arith.constant 0 : i32
    %3 = arith.cmpi eq, %arg1, %c0_i32_0 : i32
    %4 = arith.andi %2, %3 : i1
    %5 = arith.extui %4 : i1 to i32
    %c0_i32_1 = arith.constant 0 : i32
    %6 = arith.cmpi ne, %5, %c0_i32_1 : i32
    scf.if %6 {
      %cst = arith.constant 0.000000e+00 : f32
      %15 = vector.broadcast %cst : f32 to vector<1x1xf32>
      %c0_5 = arith.constant 0 : index
      %c0_6 = arith.constant 0 : index
      %16 = vector.load %arg6[%c0_5, %c0_6] : memref<1x1xf32, #tpu.memory_space<vmem>>, vector<1x1xf32>
      tpu.vector_store %arg6[%c0_5, %c0_6], %15 {strides = array<i32>} : memref<1x1xf32, #tpu.memory_space<vmem>>, vector<1x1xf32>,
      %cst_7 = arith.constant 0.000000e+00 : f32
      %17 = vector.broadcast %cst_7 : f32 to vector<1x1xf32>
      %c0_8 = arith.constant 0 : index
      %c0_9 = arith.constant 0 : index
      %18 = vector.load %arg7[%c0_8, %c0_9] : memref<1x1xf32, #tpu.memory_space<vmem>>, vector<1x1xf32>
      tpu.vector_store %arg7[%c0_8, %c0_9], %17 {strides = array<i32>} : memref<1x1xf32, #tpu.memory_space<vmem>>, vector<1x1xf32>,
      %cst_10 = arith.constant 0.000000e+00 : f32
      %19 = vector.broadcast %cst_10 : f32 to vector<1x1xf32>
      %c0_11 = arith.constant 0 : index
      %c0_12 = arith.constant 0 : index
      %20 = vector.load %arg8[%c0_11, %c0_12] : memref<1x1xf32, #tpu.memory_space<vmem>>, vector<1x1xf32>
      tpu.vector_store %arg8[%c0_11, %c0_12], %19 {strides = array<i32>} : memref<1x1xf32, #tpu.memory_space<vmem>>, vector<1x1xf32>,
    } else {
    }
    %7 = arith.index_cast %1 : i32 to index
    %c0 = arith.constant 0 : index
    %8 = vector.load %arg3[%7, %c0] : memref<8x1xi32, #tpu.memory_space<vmem>>, vector<8x1xi32>
    %c0_i32_2 = arith.constant 0 : i32
    %9 = arith.cmpi eq, %arg0, %c0_i32_2 : i32
    %10 = arith.extui %9 : i1 to i32
    %c0_i32_3 = arith.constant 0 : i32
    %11 = arith.cmpi ne, %10, %c0_i32_3 : i32
    scf.if %11 {
      %c0_5 = arith.constant 0 : index
      %c0_6 = arith.constant 0 : index
      %15 = vector.load %arg2[%c0_5, %c0_6] : memref<8x16xf32, #tpu.memory_space<vmem>>, vector<8x16xf32>
      %16 = tpu.iota {dimensions = array<i32: 1>} : vector<8x16xi32>
      %17 = vector.broadcast %8 : vector<8x1xi32> to vector<8x16xi32>
      %18 = arith.cmpi slt, %16, %17 : vector<8x16xi32>
      %19 = arith.sitofp %8 : vector<8x1xi32> to vector<8x1xf32>
      %20 = vector.shape_cast %19 : vector<8x1xf32> to vector<1x8x1xf32>
      %cst = arith.constant dense<0.000000e+00> : vector<1xf32>
      %21 = vector.multi_reduction <add>, %20, %cst [1, 2] : vector<1x8x1xf32> to vector<1xf32>
      %22 = vector.shape_cast %21 : vector<1xf32> to vector<1x1x1xf32>
      %23 = vector.extract %22[0, 0, 0] : f32 from vector<1x1x1xf32>
      %cst_7 = arith.constant 0.000000e+00 : f32
      %24 = vector.broadcast %cst_7 : f32 to vector<8x16xf32>
      %25 = arith.select %18, %15, %24 : vector<8x16xi1>, vector<8x16xf32>
      %26 = vector.shape_cast %25 : vector<8x16xf32> to vector<1x8x16xf32>
      %cst_8 = arith.constant dense<0.000000e+00> : vector<1xf32>
      %27 = vector.multi_reduction <add>, %26, %cst_8 [1, 2] : vector<1x8x16xf32> to vector<1xf32>
      %28 = vector.shape_cast %27 : vector<1xf32> to vector<1x1x1xf32>
      %29 = vector.extract %28[0, 0, 0] : f32 from vector<1x1x1xf32>
      %cst_9 = arith.constant 1.000000e+00 : f32
      %30 = arith.maximumf %23, %cst_9 : f32
      %31 = arith.divf %29, %30 : f32
      %32 = vector.broadcast %31 : f32 to vector<8x16xf32>
      %33 = arith.subf %15, %32 : vector<8x16xf32>
      %cst_10 = arith.constant 0.000000e+00 : f32
      %34 = vector.broadcast %cst_10 : f32 to vector<8x16xf32>
      %35 = arith.select %18, %33, %34 : vector<8x16xi1>, vector<8x16xf32>
      %36 = arith.mulf %35, %35 : vector<8x16xf32>
      %37 = vector.shape_cast %36 : vector<8x16xf32> to vector<1x8x16xf32>
      %cst_11 = arith.constant dense<0.000000e+00> : vector<1xf32>
      %38 = vector.multi_reduction <add>, %37, %cst_11 [1, 2] : vector<1x8x16xf32> to vector<1xf32>
      %39 = vector.shape_cast %38 : vector<1xf32> to vector<1x1x1xf32>
      %40 = vector.extract %39[0, 0, 0] : f32 from vector<1x1x1xf32>
      %c0_12 = arith.constant 0 : index
      %c0_13 = arith.constant 0 : index
      %41 = vector.load %arg6[%c0_12, %c0_13] : memref<1x1xf32, #tpu.memory_space<vmem>>, vector<1x1xf32>
      %c0_14 = arith.constant 0 : index
      %c0_15 = arith.constant 0 : index
      %42 = vector.load %arg7[%c0_14, %c0_15] : memref<1x1xf32, #tpu.memory_space<vmem>>, vector<1x1xf32>
      %43 = vector.broadcast %23 : f32 to vector<1x1xf32>
      %44 = arith.addf %41, %43 : vector<1x1xf32>
      %cst_16 = arith.constant 1.000000e+00 : f32
      %45 = vector.broadcast %cst_16 : f32 to vector<1x1xf32>
      %46 = arith.maximumf %44, %45 : vector<1x1xf32>
      %47 = vector.broadcast %31 : f32 to vector<1x1xf32>
      %48 = arith.subf %47, %42 : vector<1x1xf32>
      %c0_17 = arith.constant 0 : index
      %c0_18 = arith.constant 0 : index
      %49 = vector.load %arg6[%c0_17, %c0_18] : memref<1x1xf32, #tpu.memory_space<vmem>>, vector<1x1xf32>
      tpu.vector_store %arg6[%c0_17, %c0_18], %44 {strides = array<i32>} : memref<1x1xf32, #tpu.memory_space<vmem>>, vector<1x1xf32>,
      %50 = vector.broadcast %23 : f32 to vector<1x1xf32>
      %51 = arith.divf %50, %46 : vector<1x1xf32>
      %52 = arith.mulf %48, %51 : vector<1x1xf32>
      %53 = arith.addf %42, %52 : vector<1x1xf32>
      %c0_19 = arith.constant 0 : index
      %c0_20 = arith.constant 0 : index
      %54 = vector.load %arg7[%c0_19, %c0_20] : memref<1x1xf32, #tpu.memory_space<vmem>>, vector<1x1xf32>
      tpu.vector_store %arg7[%c0_19, %c0_20], %53 {strides = array<i32>} : memref<1x1xf32, #tpu.memory_space<vmem>>, vector<1x1xf32>,
      %c0_21 = arith.constant 0 : index
      %c0_22 = arith.constant 0 : index
      %55 = vector.load %arg8[%c0_21, %c0_22] : memref<1x1xf32, #tpu.memory_space<vmem>>, vector<1x1xf32>
      %56 = vector.broadcast %40 : f32 to vector<1x1xf32>
      %57 = arith.addf %55, %56 : vector<1x1xf32>
      %58 = arith.mulf %48, %48 : vector<1x1xf32>
      %59 = vector.broadcast %23 : f32 to vector<1x1xf32>
      %60 = arith.mulf %41, %59 : vector<1x1xf32>
      %61 = arith.divf %60, %46 : vector<1x1xf32>
      %62 = arith.mulf %58, %61 : vector<1x1xf32>
      %63 = arith.addf %57, %62 : vector<1x1xf32>
      %c0_23 = arith.constant 0 : index
      %c0_24 = arith.constant 0 : index
      %64 = vector.load %arg8[%c0_23, %c0_24] : memref<1x1xf32, #tpu.memory_space<vmem>>, vector<1x1xf32>
      tpu.vector_store %arg8[%c0_23, %c0_24], %63 {strides = array<i32>} : memref<1x1xf32, #tpu.memory_space<vmem>>, vector<1x1xf32>,
      %65 = arith.index_cast %1 : i32 to index
      %c0_25 = arith.constant 0 : index
      %66 = vector.load %arg9[%65, %c0_25] : memref<8x16xf32, #tpu.memory_space<vmem>>, vector<8x16xf32>
      tpu.vector_store %arg9[%65, %c0_25], %15 {strides = array<i32>} : memref<8x16xf32, #tpu.memory_space<vmem>>, vector<8x16xf32>,
    } else {
    }
    %c1_i32 = arith.constant 1 : i32
    %12 = arith.cmpi eq, %arg0, %c1_i32 : i32
    %13 = arith.extui %12 : i1 to i32
    %c0_i32_4 = arith.constant 0 : i32
    %14 = arith.cmpi ne, %13, %c0_i32_4 : i32
    scf.if %14 {
      %15 = arith.index_cast %1 : i32 to index
      %c0_5 = arith.constant 0 : index
      %16 = vector.load %arg9[%15, %c0_5] : memref<8x16xf32, #tpu.memory_space<vmem>>, vector<8x16xf32>
      %17 = tpu.iota {dimensions = array<i32: 1>} : vector<8x16xi32>
      %18 = vector.broadcast %8 : vector<8x1xi32> to vector<8x16xi32>
      %19 = arith.cmpi slt, %17, %18 : vector<8x16xi32>
      %c0_6 = arith.constant 0 : index
      %c0_7 = arith.constant 0 : index
      %20 = vector.load %arg6[%c0_6, %c0_7] : memref<1x1xf32, #tpu.memory_space<vmem>>, vector<1x1xf32>
      %21 = vector.shape_cast %20 : vector<1x1xf32> to vector<1x1x1xf32>
      %cst = arith.constant dense<0.000000e+00> : vector<1xf32>
      %22 = vector.multi_reduction <add>, %21, %cst [1, 2] : vector<1x1x1xf32> to vector<1xf32>
      %23 = vector.shape_cast %22 : vector<1xf32> to vector<1x1x1xf32>
      %24 = vector.extract %23[0, 0, 0] : f32 from vector<1x1x1xf32>
      %cst_8 = arith.constant 1.000000e+00 : f32
      %25 = arith.maximumf %24, %cst_8 : f32
      %c0_9 = arith.constant 0 : index
      %c0_10 = arith.constant 0 : index
      %26 = vector.load %arg7[%c0_9, %c0_10] : memref<1x1xf32, #tpu.memory_space<vmem>>, vector<1x1xf32>
      %27 = vector.shape_cast %26 : vector<1x1xf32> to vector<1x1x1xf32>
      %cst_11 = arith.constant dense<0.000000e+00> : vector<1xf32>
      %28 = vector.multi_reduction <add>, %27, %cst_11 [1, 2] : vector<1x1x1xf32> to vector<1xf32>
      %29 = vector.shape_cast %28 : vector<1xf32> to vector<1x1x1xf32>
      %30 = vector.extract %29[0, 0, 0] : f32 from vector<1x1x1xf32>
      %c0_12 = arith.constant 0 : index
      %c0_13 = arith.constant 0 : index
      %31 = vector.load %arg8[%c0_12, %c0_13] : memref<1x1xf32, #tpu.memory_space<vmem>>, vector<1x1xf32>
      %32 = vector.shape_cast %31 : vector<1x1xf32> to vector<1x1x1xf32>
      %cst_14 = arith.constant dense<0.000000e+00> : vector<1xf32>
      %33 = vector.multi_reduction <add>, %32, %cst_14 [1, 2] : vector<1x1x1xf32> to vector<1xf32>
      %34 = vector.shape_cast %33 : vector<1xf32> to vector<1x1x1xf32>
      %35 = vector.extract %34[0, 0, 0] : f32 from vector<1x1x1xf32>
      %36 = arith.divf %35, %25 : f32
      %cst_15 = arith.constant 0.000000e+00 : f32
      %37 = arith.maximumf %36, %cst_15 : f32
      %cst_16 = arith.constant 9.99999974E-6 : f32
      %38 = arith.addf %37, %cst_16 : f32
      %39 = math.rsqrt %38 : f32
      %c0_17 = arith.constant 0 : index
      %40 = memref.load %arg4[%c0_17] : memref<2xf32, #tpu.memory_space<smem>>
      %41 = arith.mulf %39, %40 : f32
      %c1 = arith.constant 1 : index
      %42 = memref.load %arg4[%c1] : memref<2xf32, #tpu.memory_space<smem>>
      %43 = arith.mulf %30, %41 : f32
      %44 = arith.subf %42, %43 : f32
      %45 = vector.broadcast %41 : f32 to vector<8x16xf32>
      %46 = arith.mulf %16, %45 : vector<8x16xf32>
      %47 = vector.broadcast %44 : f32 to vector<8x16xf32>
      %48 = arith.addf %46, %47 : vector<8x16xf32>
      %49 = arith.select %19, %48, %16 : vector<8x16xi1>, vector<8x16xf32>
      %c0_18 = arith.constant 0 : index
      %c0_19 = arith.constant 0 : index
      %50 = vector.load %arg5[%c0_18, %c0_19] : memref<8x16xf32, #tpu.memory_space<vmem>>, vector<8x16xf32>
      tpu.vector_store %arg5[%c0_18, %c0_19], %49 {strides = array<i32>} : memref<8x16xf32, #tpu.memory_space<vmem>>, vector<8x16xf32>,
    } else {
    }
    return
  }
  func.func @transform_0(%arg0: i32, %arg1: i32) -> (i32, i32) {
    %c1_i32 = arith.constant 1 : i32
    %0 = arith.subi %c1_i32, %arg0 : i32
    %1 = arith.muli %arg1, %0 : i32
    %c0_i32 = arith.constant 0 : i32
    %2 = arith.muli %c0_i32, %arg0 : i32
    %3 = arith.addi %1, %2 : i32
    %c0_i32_0 = arith.constant 0 : i32
    %c0_i32_1 = arith.constant 0 : i32
    return %3, %c0_i32_0 : i32, i32
  }
  func.func @transform_1(%arg0: i32, %arg1: i32) -> (i32, i32) {
    %c0_i32 = arith.constant 0 : i32
    %c0_i32_0 = arith.constant 0 : i32
    %c0_i32_1 = arith.constant 0 : i32
    return %c0_i32, %c0_i32_0 : i32, i32
  }
  func.func @transform_2(%arg0: i32, %arg1: i32) -> i32 {
    %c0_i32 = arith.constant 0 : i32
    %c0_i32_0 = arith.constant 0 : i32
    return %c0_i32 : i32
  }
  func.func @transform_3(%arg0: i32, %arg1: i32) -> (i32, i32) {
    %0 = arith.muli %arg1, %arg0 : i32
    %c0_i32 = arith.constant 0 : i32
    %c0_i32_0 = arith.constant 0 : i32
    return %0, %c0_i32 : i32, i32
  }
}

</mosaic_0001>

<bundles_post_ra>
// kernel: tpu_custom_call.1
= control target key start
LH: loop header
LB: loop body
LE: loop exit
PB: predicated region body
PF: predicated region fallthrough
CT: control target
= control target key end

     0   :  { %8 = vsyncpa [#allocation8], 0  ;;  %s731_s0 = inlined_call_operand.vmem [shape: f32[8,16], index: 0, kind: input, shape index: {}]   ;;  %s732_s1 = inlined_call_operand.vmem [shape: s32[8,1], index: 1, kind: input, shape index: {}]   ;;  %s733_s2 = inlined_call_operand.vmem [shape: f32[2], index: 2, kind: input, shape index: {}]   ;;  %s734_s3 = inlined_call_operand.hbm [shape: f32[8,16], index: 3, kind: output, shape index: {}]  }
   0x1   :  { %9 = vsyncpa [#allocation7], 0 }
   0x2   :  { %11 = vsyncpa [#allocation7 + $0x1], 0  ;;  %s639_s12 = smov 0   ;;  %s641_s13 = smov 0  }
   0x3   :  { %s643_s14 = smov 0  }
   0x4 LB: > { %s442_s15 = sadd.s32 4294967295, %s609_s14   ;;  %s443_s16 = sadd.s32 4294967294, %s609_s14   ;;  %s609_s14 = sphi %s643_s14, %s17_s14   ;;  %s605_s13 = sphi %s641_s13, %s739_s13   ;;  %s601_s12 = sphi %s639_s12, %s738_s12  }
   0x5   : > { %s29_s17 = sadd.s32 1, %s605_s13  ;;  %p444_p0 = scmp.ge.s32.totalorder %s609_s14, 1 }
   0x6   : > { %p31_p1 = scmp.ge.s32.totalorder %s29_s17, 2  ;;  %p134_p2 = scmp.lt.s32.totalorder %s609_s14, 3 }
   0x7   : > { %p661_p3 = scmp.eq.s32.totalorder %s442_s15, 0  ;;  %s150_s22 = sshll.u32 %s733_s2, 4  ;;  %s151_s22 = int_to_ptr.vmem [resolvable:$true] %s150_s22 }
   0x8   : > { %s741_s17 = smov (%p31_p1, %s29_s17), 0  ;;  %p667_p4 = pnand %p444_p0, %p134_p2 }
   0x9   : > { %s540_s23 = scalar_lea.vmem %s151_s22, 16  ;;  %p548_p11 = scmp.lt.s32.totalorder %s151_s22, %s151_s22 }
   0xa   : > { %p485_p5 = pneg %p667_p4  ;;  %p541_p7 = scmp.ne.s32.totalorder %s151_s22, %s540_s23 }
   0xb   : > { %p549_p12 = scmp.lt.s32.totalorder %s540_s23, %s540_s23 }
   0xc   : > { %p486_p6 = pnand %p661_p3, %p485_p5 }
   0xd   : > { %p550_p13 = por %p549_p12, %p548_p11 }
   0xe   : > { %p542_p8 = pneg %p486_p6 }
  0x10   : > { %p543_p9 = pnand %p542_p8, %p541_p7 }
  0x12   : > { %p544_p10 = pneg %p543_p9 }
  0x14   : > { %p551_p0 = pnand %p550_p13, %p544_p10 }
  0x16   : > { %554 = shalt.err (!%p551_p0)
}
  0x17   : > { %s611_s24 = smov [#allocation6]   ;;  %174 = sbr.rel (%p667_p4) target bundleno = 808 (0x328), region = 32 }
  0x18   : > { %488 = dma.vmem_to_smem (!%p486_p6), %s151_s22, 16, %s611_s24, [#allocation8]  }
  0x1c   : > { %592 = dma.done.wait (%p661_p3), [#allocation8], 16  }
  0x1d   : > { %594 = vsyncadd (%p661_p3), [#allocation8], 4294967280 }
  0x1e   : > { %180 = sfence }
  0x1f   : > { %p210_p1 = scmp.eq.s32.totalorder %s601_s12, 0 }
  0x20   : > { %vm216_vm0 = vcmask (%p210_p1), 0   ;;  %v612_v0 = vmov (%p210_p1), 0.0  }
  0x21   : > { %215 = sbr.rel (!%p210_p1) target bundleno = 38 (0x26), region = 40  ;;  %217 = vst.msk [vmem:[#allocation2] sm:$0x1] (%p210_p1), %vm216_vm0, %v612_v0  ;;  %218 = vst.msk [vmem:[#allocation3] sm:$0x1] (%p210_p1), %vm216_vm0, %v612_v0 }
  0x22   : > { %219 = vst.msk [vmem:[#allocation4] sm:$0x1] (%p210_p1), %vm216_vm0, %v612_v0 }
  0x26 PF: > { %v688_v1 = vld [vmem:[%s732_s1] sm:$0xff]  ;;  %p451_p2 = scmp.ne.s32.totalorder %s601_s12, 0 }
  0x27   : > { %s614_s30 = smov (!%p451_p2), 1.0  }
  0x28   : > { %224 = sbr.rel (%p451_p2) target bundleno = 590 (0x24e), region = 44 }
  0x2d   : > { %v613_v2 = vmov 0   ;;  %v225_v3 = vld [vmem:[%s731_s0] sm:$0xff]  ;;  %vm245_vm1 = vcmask 130048   ;;  %v232_v4 = vcvt.s32.f32 %v688_v1  ;;  %vm233_vm2 = vcmask 7168  }
  0x2e   : > { %530 = vset.pattern.permute.xlu0 %v613_v2  ;;  %298 = vst.msk [vmem:[#allocation5] sm:$0xff] %vm245_vm1, %v225_v3  ;;  %v226_v6 = vlaneseq  ;;  %v275_v18 = vld [vmem:[#allocation2] sm:$0x1]  ;;  %vm281_vm4 = vcmask 0   ;;  %v276_v35 = vld [vmem:[#allocation3] sm:$0x1] }
  0x2f   : > { %229 = vperm.xlu0 %530, %v688_v1   ;;  %v234_v5 = vsel %vm233_vm2, %v232_v4, 0.0  ;;  %v288_v53 = vld [vmem:[#allocation4] sm:$0x1] }
  0x30   : > { %v227_v7 = vand.u32 127, %v226_v6 }
  0x4e   : > { %235 = vadd.xlane.f32.xlu0 %v234_v5 }
  0xaa   : > { %v230_v8 = vpop.permute.xlu0 %229 }
  0xab   : > { %vm231_vm3 = vcmp.lt.s32.totalorder %v227_v7, %v230_v8 }
  0xac   : > { %v244_v9 = vsel %vm231_vm3, %v225_v3, 0.0 }
  0xad   : > { %v246_v10 = vsel %vm245_vm1, %v244_v9, 0.0 }
  0xae   : > { %247 = vadd.xlane.f32.xlu1 %v246_v10 }
  0xd7   : > { %v236_v11 = vpop.xlane.xlu0 %235 }
  0xd8   : > { %v237_v12 = vrot.slane %v236_v11, 4 }
  0xda   : > { %v238_v13 = vadd.f32 %v237_v12, %v236_v11 }
  0xdc   : > { %v239_v14 = vrot.slane %v238_v13, 2 }
  0xde   : > { %v240_v15 = vadd.f32 %v239_v14, %v238_v13 }
  0xe0   : > { %v241_v16 = vrot.slane %v240_v15, 1 }
  0xe2   : > { %v242_v17 = vadd.f32 %v241_v16, %v240_v15 }
  0xe4   : > { %459 = vpush %v242_v17 }
 0x115   : > { %s460_s29 = spop %459 }
 0x116   : > { %v277_v19 = vstv %s460_s29  ;;  %s256_s4 = smax.f32 %s614_s30, %s460_s29 }
 0x117   : > { %v278_v20 = vadd.f32 %v277_v19, %v275_v18  ;;  %v292_v21 = vmul.f32 %v277_v19, %v275_v18  ;;  %v257_v26 = vstv %s256_s4 }
 0x119   : > { %v279_v22 = vmax.f32 %v278_v20, 1.0  ;;  %282 = vst.msk [vmem:[#allocation2] sm:$0x1] %vm281_vm4, %v278_v20 }
 0x11b   : > { %531 = vrcp.f32 %v279_v22 }
 0x11c   : > { %533 = vrcp.f32 %v257_v26 }
 0x128   : > { %v532_v23 = vpop.eup %531 }
 0x129   : > { %v284_v24 = vmul.f32 %v532_v23, %v277_v19  ;;  %v293_v25 = vmul.f32 %v532_v23, %v292_v21  ;;  %v534_v34 = vpop.eup %533 }
 0x137   : > { %v248_v27 = vpop.xlane.xlu1 %247 }
 0x138   : > { %v249_v28 = vrot.slane %v248_v27, 4 }
 0x13a   : > { %v250_v29 = vadd.f32 %v249_v28, %v248_v27 }
 0x13c   : > { %v251_v30 = vrot.slane %v250_v29, 2 }
 0x13e   : > { %v252_v31 = vadd.f32 %v251_v30, %v250_v29 }
 0x140   : > { %v253_v32 = vrot.slane %v252_v31, 1 }
 0x142   : > { %v254_v33 = vadd.f32 %v253_v32, %v252_v31 }
 0x144   : > { %461 = vpush %v254_v33 }
 0x145   : > { %463 = vpush %v534_v34 }
 0x175   : > { %s462_s5 = spop %461 }
 0x176   : > { %s464_s6 = spop %463 }
 0x177   : > { %s260_s7 = smul.f32 %s464_s6, %s462_s5 }
 0x179   : > { %v261_v36 = vstv %s260_s7 }
 0x17a   : > { %v262_v37 = vsub.f32 %v225_v3, %v261_v36  ;;  %v280_v38 = vsub.f32 %v261_v36, %v276_v35 }
 0x17c   : > { %v285_v39 = vmul.f32 %v284_v24, %v280_v38  ;;  %v291_v40 = vmul.f32 %v280_v38, %v280_v38  ;;  %v263_v41 = vsel %vm231_vm3, %v262_v37, 0.0 }
 0x17d   : > { %v264_v42 = vmul.f32 %v263_v41, %v263_v41 }
 0x17e   : > { %v286_v43 = vadd.f32 %v285_v39, %v276_v35  ;;  %v294_v44 = vmul.f32 %v293_v25, %v291_v40 }
 0x17f   : > { %v265_v45 = vsel %vm245_vm1, %v264_v42, 0.0 }
 0x180   : > { %266 = vadd.xlane.f32.xlu1 %v265_v45  ;;  %287 = vst.msk [vmem:[#allocation3] sm:$0x1] %vm281_vm4, %v286_v43 }
 0x209   : > { %v267_v46 = vpop.xlane.xlu1 %266 }
 0x20a   : > { %v268_v47 = vrot.slane %v267_v46, 4 }
 0x20c   : > { %v269_v48 = vadd.f32 %v268_v47, %v267_v46 }
 0x20e   : > { %v270_v49 = vrot.slane %v269_v48, 2 }
 0x210   : > { %v271_v50 = vadd.f32 %v270_v49, %v269_v48 }
 0x212   : > { %v272_v51 = vrot.slane %v271_v50, 1 }
 0x214   : > { %v273_v52 = vadd.f32 %v272_v51, %v271_v50 }
 0x216   : > { %465 = vpush %v273_v52 }
 0x247   : > { %s466_s8 = spop %465 }
 0x248   : > { %v289_v54 = vstv %s466_s8 }
 0x249   : > { %v290_v55 = vadd.f32 %v289_v54, %v288_v53 }
 0x24b   : > { %v295_v56 = vadd.f32 %v294_v44, %v290_v55 }
 0x24d   : > { %296 = vst.msk [vmem:[#allocation4] sm:$0x1] %vm281_vm4, %v295_v56 }
 0x24e PF: > { %p452_p3 = scmp.ne.s32.totalorder %s601_s12, 1 }
 0x24f   : > { %s616_s10 = smov (!%p452_p3), 1.0   ;;  %s617_s21 = smov (!%p452_p3), 0.0  }
 0x250   : > { %302 = sbr.rel (%p452_p3) target bundleno = 795 (0x31b), region = 48  ;;  %s330_s24 = sld [smem:[#allocation6]] (!%p452_p3) }
 0x251   : > { %s453_s25 = sld [smem:[#allocation6 + $0x1]] (!%p452_p3) }
 0x255   : > { %v311_v57 = vld [vmem:[#allocation2] sm:$0x1]  ;;  %v315_v58 = vld [vmem:[#allocation3] sm:$0x1]  ;;  %v318_v59 = vld [vmem:[#allocation4] sm:$0x1] }
 0x256   : > { %467 = vpush %v311_v57  ;;  %v615_v60 = vmov 0   ;;  %v304_v2 = vld [vmem:[#allocation5] sm:$0xff]  ;;  %vm340_vm6 = vcmask 130048  }
 0x257   : > { %535 = vset.pattern.permute.xlu0 %v615_v60  ;;  %469 = vpush %v315_v58 }
 0x258   : > { %308 = vperm.xlu0 %535, %v688_v1   ;;  %471 = vpush %v318_v59  ;;  %v305_v1 = vlaneseq }
 0x25a   : > { %v306_v4 = vand.u32 127, %v305_v1 }
 0x287   : > { %s468_s9 = spop %467 }
 0x288   : > { %s314_s11 = smax.f32 %s616_s10, %s468_s9  ;;  %s470_s18 = spop %469 }
 0x289   : > { %v321_v61 = vstv %s314_s11  ;;  %s472_s12 = spop %471 }
 0x28a   : > { %536 = vrcp.f32 %v321_v61 }
 0x297   : > { %v537_v62 = vpop.eup %536 }
 0x298   : > { %473 = vpush %v537_v62 }
 0x2c9   : > { %s474_s19 = spop %473 }
 0x2ca   : > { %s324_s20 = smul.f32 %s474_s19, %s472_s12 }
 0x2cc   : > { %s325_s22 = smax.f32 %s617_s21, %s324_s20 }
 0x2cd   : > { %s326_s23 = sadd.f32 1e-05, %s325_s22 }
 0x2cf   : > { %v327_v63 = vstv %s326_s23 }
 0x2d0   : > { %538 = vrsqrt.f32 %v327_v63 }
 0x2d3   : > { %v309_v5 = vpop.permute.xlu0 %308 }
 0x2d4   : > { %vm310_vm5 = vcmp.lt.s32.totalorder %v306_v4, %v309_v5 }
 0x2dd   : > { %v539_v0 = vpop.eup %538 }
 0x2de   : > { %475 = vpush %v539_v0 }
 0x30f   : > { %s476_s26 = spop %475 }
 0x310   : > { %s331_s27 = smul.f32 %s476_s26, %s330_s24 }
 0x312   : > { %s333_s28 = smul.f32 %s470_s18, %s331_s27  ;;  %v335_v3 = vstv %s331_s27 }
 0x313   : > { %v336_v6 = vmul.f32 %v335_v3, %v304_v2 }
 0x314   : > { %s334_s29 = ssub.f32 %s453_s25, %s333_s28 }
 0x316   : > { %v337_v7 = vstv %s334_s29 }
 0x317   : > { %v338_v8 = vadd.f32 %v337_v7, %v336_v6 }
 0x319   : > { %v339_v9 = vsel %vm310_vm5, %v338_v8, %v304_v2 }
 0x31a   : > { %341 = vst.msk [vmem:[#allocation9] sm:$0xff] %vm340_vm6, %v339_v9 }
 0x31b PF: > { %p708_p4 = scmp.eq.s32.totalorder %s442_s15, 1  ;;  %s618_s4 = smov [#allocation9]  }
 0x31c   : > { %s357_s5 = sshll.u32 %s618_s4, 4  ;;  %s358_s5 = int_to_ptr.vmem [resolvable:$true] %s357_s5 }
 0x31d   : > { %s555_s6 = scalar_lea.vmem %s358_s5, 128  ;;  %s561_s7 = scalar_lea.vmem %s358_s5, 256 }
 0x31e   : > { %p556_p5 = scmp.ne.s32.totalorder %s358_s5, %s555_s6  ;;  %p562_p8 = scmp.lt.s32.totalorder %s358_s5, %s358_s5 }
 0x31f   : > { %p563_p9 = scmp.lt.s32.totalorder %s561_s7, %s555_s6 }
 0x320   : > { %p557_p6 = pnand %p556_p5, %p708_p4 }
 0x321   : > { %p564_p10 = por %p563_p9, %p562_p8 }
 0x322   : > { %p558_p7 = pneg %p557_p6 }
 0x324   : > { %p565_p11 = pnand %p564_p10, %p558_p7 }
 0x326   : > { %568 = shalt.err (!%p565_p11)
}
 0x327   : > { %482 = dma.vmem_to_hbm [thread:$0]  (%p708_p4), %s358_s5, 128, %s734_s3, [#allocation7]  }
 0x328 PF: > { %p496_p12 = scmp.ge.s32.totalorder %s609_s14, 2  ;;  %p497_p13 = scmp.eq.s32.totalorder %s443_s16, 1 }
 0x32a   : > { %p490_p0 = pnand %p497_p13, %p496_p12 }
 0x32c   : > { %p491_p1 = pneg %p490_p0 }
 0x32e   : > { %596 = dma.done.wait (%p491_p1), [#allocation7], 128  }
 0x32f   : > { %598 = vsyncadd (%p491_p1), [#allocation7], 4294967168  ;;  %s17_s14 = sadd.s32 1, %s609_s14   ;;  %s738_s12 = smov %s605_s13 }
 0x330   : > { %p14_p2 = scmp.ge.s32.totalorder %s17_s14, 4   ;;  %s739_s13 = smov %s741_s17 }
 0x332   :  { %16 = sbr.rel (!%p14_p2) target bundleno = 4 (0x4), region = 87 }
 0x337   :  { %375 = vsyncpa [#allocation7], 1 }
 0x338   :  { %377 = vsyncpa [#allocation7 + $0x1], 1 }
 0x339   :  { %378 = vsyncpa [#allocation8], 1 }
 0x33a   :  { %380 = vsyncpa [#allocation8 + $0x1], 1 }

</bundles_post_ra>
